<compile_context>
chip_gen: v7x
topology: tpu7x:2x2x1
jax: 0.10.0
libtpu: 0.0.40
codegen_flags: <defaults>
</compile_context>

<pallas_src>
import jax
import jax.numpy as jnp
import numpy as np
from jax.experimental import pallas as pl
from jax.experimental.pallas import tpu as pltpu

NEG_SLOPE = 0.01  # nn.LeakyReLU() default negative_slope


def _downblock_kernel(x_ref, w_ref, b_ref, y_ref):
    # x_ref : (1, Ht, Wo+1, 6*Cin)  packed phases for Ht output rows,
    #         left column zero-padded (conv's left zero pad).
    # w_ref : (2, 6*Cin, Cout)  [0] = taps hitting phases at (oy, ox),
    #                           [1] = taps hitting phases at (oy, ox-1).
    # b_ref : (1, Cout)
    # y_ref : (1, Ht*Wo, Cout)
    _, ht, wp1, k = x_ref.shape
    wo = wp1 - 1

    blk = x_ref[0]                                   # (Ht, Wo+1, 6*Cin)
    x_cur = blk[:, 1:, :].reshape(ht * wo, k)        # phases at (oy, ox)
    x_lft = blk[:, :wo, :].reshape(ht * wo, k)       # phases at (oy, ox-1)

    acc = jnp.dot(x_cur, w_ref[0], preferred_element_type=jnp.float32)
    acc = acc + jnp.dot(x_lft, w_ref[1], preferred_element_type=jnp.float32)
    acc = acc + b_ref[...]                           # (1, Cout) broadcast
    y_ref[0] = jnp.where(acc > 0, acc, NEG_SLOPE * acc).astype(y_ref.dtype)


def _pick_row_tile(ho, wo, cin, cout, itemsize=4, budget_bytes=6 << 20):
    """Largest divisor of ho whose (input+output) block fits a conservative
    single-copy VMEM budget (x2 double-buffering still < 16 MiB scoped)."""
    row_bytes = ((wo + 1) * 6 * cin + wo * cout) * itemsize
    valid = [t for t in range(1, ho + 1)
             if ho % t == 0 and (t == ho or (t * wo) % 8 == 0)]
    fits = [t for t in valid if t * row_bytes <= budget_bytes]
    return max(fits) if fits else min(valid)


def down_block(x, w_pt, b):
    """x: (N, H, W, Cin) f32 (NHWC); w_pt: (Cout, Cin, 3, 3) (PyTorch Conv2d
    layout); b: (Cout,).  Returns (N, ceil(H/2), ceil(W/2), Cout)."""
    n, h, w, cin = x.shape
    cout = w_pt.shape[0]
    dtype = jnp.float32

    # Pad H/W up to even (the added zero row/col coincides with the conv's
    # own zero padding, so results are unchanged).
    he, we = h + (h % 2), w + (w % 2)
    if (he, we) != (h, w):
        x = jnp.pad(x, ((0, 0), (0, he - h), (0, we - w), (0, 0)))
    ho, wo = he // 2, we // 2

    # ---- one-pass input packing: space-to-depth + row shift + left pad ----
    xr = x.reshape(n, ho, 2, wo, 2, cin)
    pa = xr[:, :, 0, :, 0, :]                       # x[2j,   2i  ]
    pb = xr[:, :, 0, :, 1, :]                       # x[2j,   2i+1]
    pc = xr[:, :, 1, :, 0, :]                       # x[2j+1, 2i  ]
    pd = xr[:, :, 1, :, 1, :]                       # x[2j+1, 2i+1]
    zrow = jnp.zeros((n, 1, wo, cin), dtype)
    pcp = jnp.concatenate([zrow, pc[:, :-1]], axis=1)   # C at row j-1
    pdp = jnp.concatenate([zrow, pd[:, :-1]], axis=1)   # D at row j-1
    ph = jnp.concatenate([pa, pb, pc, pd, pcp, pdp], axis=-1)  # (N,Ho,Wo,6Cin)
    xin = jnp.pad(ph, ((0, 0), (0, 0), (1, 0), (0, 0)))        # (N,Ho,Wo+1,6Cin)

    # ---- pre-packed weights: 9 taps -> two (6*Cin, Cout) matrices ---------
    wt = jnp.transpose(w_pt, (2, 3, 1, 0)).astype(dtype)       # (3,3,Cin,Cout)
    z = jnp.zeros((cin, cout), dtype)
    # channel order [A, B, C, D, Cp, Dp]
    w_cur = jnp.concatenate([wt[1, 1], wt[1, 2], wt[2, 1], wt[2, 2],
                             wt[0, 1], wt[0, 2]], axis=0)
    w_lft = jnp.concatenate([z, wt[1, 0], z, wt[2, 0],
                             z, wt[0, 0]], axis=0)
    w_pk = jnp.stack([w_cur, w_lft], axis=0)                   # (2, 6Cin, Cout)
    b2 = b.reshape(1, cout).astype(dtype)

    ht = _pick_row_tile(ho, wo, cin, cout)
    grid = (n, ho // ht)

    y = pl.pallas_call(
        _downblock_kernel,
        out_shape=jax.ShapeDtypeStruct((n, ho * wo, cout), dtype),
        grid=grid,
        in_specs=[
            pl.BlockSpec((1, ht, wo + 1, 6 * cin), lambda i, r: (i, r, 0, 0)),
            pl.BlockSpec((2, 6 * cin, cout), lambda i, r: (0, 0, 0)),
            pl.BlockSpec((1, cout), lambda i, r: (0, 0)),
        ],
        out_specs=pl.BlockSpec((1, ht * wo, cout), lambda i, r: (i, r, 0)),
        compiler_params=pltpu.CompilerParams(
            dimension_semantics=("parallel", "parallel")),
    )(xin, w_pk, b2)

    # Free metadata reshape (trailing contiguous dims) — no extra HBM pass.
    return y.reshape(n, ho, wo, cout)


def ref_down_block(x, w_pt, b):
    """Pure-JAX reference: Conv2d(k=3, s=2, p=1) + LeakyReLU, NHWC."""
    rhs = jnp.transpose(w_pt, (2, 3, 1, 0))        # (kh, kw, Cin, Cout) HWIO
    y = jax.lax.conv_general_dilated(
        x, rhs, window_strides=(2, 2), padding=((1, 1), (1, 1)),
        dimension_numbers=('NHWC', 'HWIO', 'NHWC'))
    y = y + b.reshape(1, 1, 1, -1)
    return jnp.where(y > 0, y, NEG_SLOPE * y)


if __name__ == "__main__":
    key = jax.random.PRNGKey(0)
    kx, kw, kb = jax.random.split(key, 3)

    N, Cin, Cout, H, W = 2, 4, 8, 16, 16
    x = jax.random.normal(kx, (N, H, W, Cin), jnp.float32)
    w_pt = jax.random.normal(kw, (Cout, Cin, 3, 3), jnp.float32) * 0.1
    b = jax.random.normal(kb, (Cout,), jnp.float32) * 0.1

    y = down_block(x, w_pt, b)
    y = jax.block_until_ready(y)

    assert y.shape == (N, H // 2, W // 2, Cout), y.shape
    y_ref = ref_down_block(x, w_pt, b)
    np.testing.assert_allclose(np.asarray(y), np.asarray(y_ref),
                               rtol=1e-4, atol=1e-4)
    print("KERNEL_OK")
</pallas_src>

<mosaic_0001>
module attributes {stable_mosaic.version = 11 : i64} {
  func.func @_downblock_kernel(%arg0: i32, %arg1: i32, %arg2: memref<1x8x9x24xf32, #tpu.memory_space<vmem>>, %arg3: memref<2x24x8xf32, #tpu.memory_space<vmem>>, %arg4: memref<1x8xf32, #tpu.memory_space<vmem>>, %arg5: memref<1x64x8xf32, #tpu.memory_space<vmem>>) attributes {dimension_semantics = [#tpu.dimension_semantics<parallel>, #tpu.dimension_semantics<parallel>], iteration_bounds = array<i64: 2, 1>, scalar_prefetch = 0 : i64, scratch_operands = 0 : i64, tpu.core_type = #tpu.core_type<tc>, window_params = [{transform_indices = @transform_0, window_bounds = array<i64: 1, 8, 9, 24>}, {pipeline_mode = #tpu.pipeline_mode<synchronous>, transform_indices = @transform_1, window_bounds = array<i64: 2, 24, 8>}, {pipeline_mode = #tpu.pipeline_mode<synchronous>, transform_indices = @transform_2, window_bounds = array<i64: 1, 8>}, {transform_indices = @transform_3, window_bounds = array<i64: 1, 64, 8>}]} {
    %c0 = arith.constant 0 : index
    %c0_0 = arith.constant 0 : index
    %c0_1 = arith.constant 0 : index
    %c0_2 = arith.constant 0 : index
    %0 = vector.load %arg2[%c0, %c0_0, %c0_1, %c0_2] : memref<1x8x9x24xf32, #tpu.memory_space<vmem>>, vector<1x8x9x24xf32>
    %1 = vector.shape_cast %0 : vector<1x8x9x24xf32> to vector<8x9x24xf32>
    %2 = vector.extract_strided_slice %1 {offsets = [0, 1, 0], sizes = [8, 8, 24], strides = [1, 1, 1]} : vector<8x9x24xf32> to vector<8x8x24xf32>
    %3 = vector.shape_cast %2 : vector<8x8x24xf32> to vector<64x24xf32>
    %4 = vector.extract_strided_slice %1 {offsets = [0, 0, 0], sizes = [8, 8, 24], strides = [1, 1, 1]} : vector<8x9x24xf32> to vector<8x8x24xf32>
    %5 = vector.shape_cast %4 : vector<8x8x24xf32> to vector<64x24xf32>
    %c0_3 = arith.constant 0 : index
    %c0_4 = arith.constant 0 : index
    %c0_5 = arith.constant 0 : index
    %6 = vector.load %arg3[%c0_3, %c0_4, %c0_5] : memref<2x24x8xf32, #tpu.memory_space<vmem>>, vector<1x24x8xf32>
    %7 = vector.shape_cast %6 : vector<1x24x8xf32> to vector<24x8xf32>
    %cst = arith.constant dense<0.000000e+00> : vector<64x8xf32>
    %8 = tpu.matmul %3, %7, %cst {dimension_numbers = #tpu.dot_dimension_numbers<[1], [0], [0], [1], [0, 0, 1, 1], [], []>} : vector<64x24xf32>, vector<24x8xf32>, vector<64x8xf32> -> vector<64x8xf32>
    %c1 = arith.constant 1 : index
    %c0_6 = arith.constant 0 : index
    %c0_7 = arith.constant 0 : index
    %9 = vector.load %arg3[%c1, %c0_6, %c0_7] : memref<2x24x8xf32, #tpu.memory_space<vmem>>, vector<1x24x8xf32>
    %10 = vector.shape_cast %9 : vector<1x24x8xf32> to vector<24x8xf32>
    %cst_8 = arith.constant dense<0.000000e+00> : vector<64x8xf32>
    %11 = tpu.matmul %5, %10, %cst_8 {dimension_numbers = #tpu.dot_dimension_numbers<[1], [0], [0], [1], [0, 0, 1, 1], [], []>} : vector<64x24xf32>, vector<24x8xf32>, vector<64x8xf32> -> vector<64x8xf32>
    %12 = arith.addf %8, %11 : vector<64x8xf32>
    %c0_9 = arith.constant 0 : index
    %c0_10 = arith.constant 0 : index
    %13 = vector.load %arg4[%c0_9, %c0_10] : memref<1x8xf32, #tpu.memory_space<vmem>>, vector<1x8xf32>
    %14 = vector.broadcast %13 : vector<1x8xf32> to vector<64x8xf32>
    %15 = arith.addf %12, %14 : vector<64x8xf32>
    %cst_11 = arith.constant 0.000000e+00 : f32
    %16 = vector.broadcast %cst_11 : f32 to vector<64x8xf32>
    %17 = arith.cmpf ogt, %15, %16 : vector<64x8xf32>
    %cst_12 = arith.constant 0.00999999977 : f32
    %18 = vector.broadcast %cst_12 : f32 to vector<64x8xf32>
    %19 = arith.mulf %18, %15 : vector<64x8xf32>
    %20 = arith.select %17, %15, %19 : vector<64x8xi1>, vector<64x8xf32>
    %c0_13 = arith.constant 0 : index
    %c0_14 = arith.constant 0 : index
    %c0_15 = arith.constant 0 : index
    %21 = vector.load %arg5[%c0_13, %c0_14, %c0_15] : memref<1x64x8xf32, #tpu.memory_space<vmem>>, vector<1x64x8xf32>
    %22 = vector.shape_cast %21 : vector<1x64x8xf32> to vector<64x8xf32>
    %23 = vector.shape_cast %20 : vector<64x8xf32> to vector<1x64x8xf32>
    tpu.vector_store %arg5[%c0_13, %c0_14, %c0_15], %23 {strides = array<i32>} : memref<1x64x8xf32, #tpu.memory_space<vmem>>, vector<1x64x8xf32>,
    return
  }
  func.func @transform_0(%arg0: i32, %arg1: i32) -> (i32, i32, i32, i32) {
    %c0_i32 = arith.constant 0 : i32
    %c0_i32_0 = arith.constant 0 : i32
    %c0_i32_1 = arith.constant 0 : i32
    return %arg0, %arg1, %c0_i32, %c0_i32_0 : i32, i32, i32, i32
  }
  func.func @transform_1(%arg0: i32, %arg1: i32) -> (i32, i32, i32) {
    %c0_i32 = arith.constant 0 : i32
    %c0_i32_0 = arith.constant 0 : i32
    %c0_i32_1 = arith.constant 0 : i32
    %c0_i32_2 = arith.constant 0 : i32
    return %c0_i32, %c0_i32_0, %c0_i32_1 : i32, i32, i32
  }
  func.func @transform_2(%arg0: i32, %arg1: i32) -> (i32, i32) {
    %c0_i32 = arith.constant 0 : i32
    %c0_i32_0 = arith.constant 0 : i32
    %c0_i32_1 = arith.constant 0 : i32
    return %c0_i32, %c0_i32_0 : i32, i32
  }
  func.func @transform_3(%arg0: i32, %arg1: i32) -> (i32, i32, i32) {
    %c0_i32 = arith.constant 0 : i32
    %c0_i32_0 = arith.constant 0 : i32
    return %arg0, %arg1, %c0_i32 : i32, i32, i32
  }
}

</mosaic_0001>

<bundles_post_ra>
// kernel: tpu_custom_call.1
= control target key start
LH: loop header
LB: loop body
LE: loop exit
PB: predicated region body
PF: predicated region fallthrough
CT: control target
= control target key end

     0   :  { %s833_s12 = smov 0   ;;  %s835_s13 = smov 0   ;;  %s951_s0 = inlined_call_operand.vmem [shape: f32[2,8,9,24], index: 0, kind: input, shape index: {}]   ;;  %s952_s1 = inlined_call_operand.vmem [shape: f32[2,24,8], index: 1, kind: input, shape index: {}]   ;;  %s953_s2 = inlined_call_operand.vmem [shape: f32[1,8], index: 2, kind: input, shape index: {}]   ;;  %s954_s3 = inlined_call_operand.vmem [shape: f32[2,64,8], index: 3, kind: output, shape index: {}]  }
   0x1   :  { %s837_s14 = smov 0  }
   0x2 LB: > { %s25_s15 = sadd.s32 1, %s807_s13  ;;  %p662_p0 = scmp.ge.s32.totalorder %s811_s14, 1  ;;  %s811_s14 = sphi %s837_s14, %s13_s14   ;;  %s807_s13 = sphi %s835_s13, %s956_s13   ;;  %s803_s12 = sphi %s833_s12, %s955_s12  }
   0x3   : > { %p27_p1 = scmp.ge.s32.totalorder %s25_s15, 2  ;;  %p159_p2 = scmp.lt.s32.totalorder %s811_s14, 3 }
   0x5   : > { %s958_s15 = smov (%p27_p1, %s25_s15), 0  ;;  %p160_p3 = pnand %p662_p0, %p159_p2 }
   0x6   : > { %v667_v0 = vld [vmem:[%s952_s1 + $0x18] sm:$0xff] (!%p160_p3)  ;;  %v668_v1 = vld [vmem:[%s952_s1 + $0x20] sm:$0xff] (!%p160_p3)  ;;  %p193_p4 = scmp.lt.s32.totalorder (!%p160_p3), %s803_s12, 1  ;;  %v271_v4 = vld [vmem:[%s952_s1 + $0x8] sm:$0xff] (!%p160_p3)  ;;  %vm277_vm0 = vcmask (!%p160_p3), 195584   ;;  %vm245_vm1 = vcmask (!%p160_p3), 1046528  }
   0x7   : > { %163 = sbr.rel (%p160_p3) target bundleno = 255 (0xff), region = 32  ;;  %v270_v2 = vld [vmem:[%s952_s1] sm:$0xff] (!%p160_p3)  ;;  %v749_v3 = vpack.c.bf16 (!%p160_p3), %v668_v1, %v667_v0  ;;  %v669_v6 = vld [vmem:[%s952_s1 + $0x28] sm:$0xff] (!%p160_p3)  ;;  %v272_v7 = vld [vmem:[%s952_s1 + $0x10] sm:$0xff] (!%p160_p3)  ;;  %vm559_vm3 = vcmask (!%p160_p3), 64512  }
   0x8   : > { %v753_v5 = vpack.c.bf16 (!%p160_p3), %v271_v4, %v270_v2  ;;  %v686_v51 = vld [vmem:[%s953_s2] ss:$0 sm:$0xff] (!%p160_p3) }
   0x9   : > { %750 = vmatprep.subr.bf16.mxu1 (!%p160_p3), %v749_v3 }
   0xa   : > { %752 = vmatpush3.bf16.msra.mxu1 (!%p160_p3), %v749_v3  ;;  %754 = vmatprep.subr.bf16.mxu0 (!%p160_p3), %v753_v5 }
   0xb   : > { %756 = vmatpush3.bf16.msra.mxu0 (!%p160_p3), %v753_v5  ;;  %717 = vmatprep.subr.mxu1 (!%p160_p3), %v669_v6 }
   0xc   : > { %735 = vmatprep.subr.mxu0 (!%p160_p3), %v272_v7 }
   0xe   : > { %s960_s12 = smov (!%p193_p4, %s803_s12), 1  ;;  %718 = vmatpush3.msra.mxu1 %v669_v6 }
   0xf   : > { %s689_s28 = sshll.u32 %s960_s12, 7  ;;  %736 = vmatpush3.msra.mxu0 %v272_v7  ;;  %s690_s7 = sshll.u32 %s960_s12, 6 }
  0x10   : > { %s875_s4 = scalar_lea.vmem %s951_s0, %s689_s28  ;;  %s924_s10 = scalar_lea.vmem %s954_s3, %s690_s7 }
  0x11   : > { %v213_v8 = vld [vmem:[%s875_s4] sm:$0xff]  ;;  %v215_v9 = vld [vmem:[%s875_s4 + $0x10] sm:$0xff]  ;;  %v214_v10 = vld [vmem:[%s875_s4 + $0x8] sm:$0x1] }
  0x12   : > { %v246_v11 = vrot.slane %v213_v8, 1  ;;  %719 = vmatprep.mubr.msk.f32.mxu1 %vm277_vm0, %v213_v8  ;;  %v249_v12 = vrot.slane %v215_v9, 1  ;;  %v247_v13 = vrot.slane %v214_v10, 1  ;;  %v216_v14 = vld [vmem:[%s875_s4 + $0x18] sm:$0x1]  ;;  %v217_v15 = vld [vmem:[%s875_s4 + $0x20] sm:$0xff] }
  0x13   : > { %v250_v16 = vrot.slane %v216_v14, 1  ;;  %v252_v17 = vrot.slane %v217_v15, 1  ;;  %v219_v18 = vld [vmem:[%s875_s4 + $0x30] sm:$0xff]  ;;  %v218_v19 = vld [vmem:[%s875_s4 + $0x28] sm:$0x1]  ;;  %v221_v20 = vld [vmem:[%s875_s4 + $0x40] sm:$0xff]  ;;  %720 = vmatmul.mubr.msk.f32.vlgmr.msra.gmra.mrb[0].mxu1 %vm277_vm0, %v215_v9 }
  0x14   : > { %v248_v21 = vsel %vm245_vm1, %v246_v11, %v247_v13  ;;  %v255_v22 = vrot.slane %v219_v18, 1  ;;  %v253_v23 = vrot.slane %v218_v19, 1  ;;  %v220_v24 = vld [vmem:[%s875_s4 + $0x38] sm:$0x1]  ;;  %v258_v25 = vrot.slane %v221_v20, 1  ;;  %v223_v26 = vld [vmem:[%s875_s4 + $0x50] sm:$0xff]  ;;  %722 = vmatprep.mubr.msk.f32.mxu1 %vm277_vm0, %v217_v15 }
  0x15   : > { %737 = vmatprep.mubr.msk.f32.mxu0 %vm277_vm0, %v248_v21  ;;  %v251_v27 = vsel %vm245_vm1, %v249_v12, %v250_v16  ;;  %v256_v28 = vrot.slane %v220_v24, 1  ;;  %v222_v29 = vld [vmem:[%s875_s4 + $0x48] sm:$0x1]  ;;  %v224_v30 = vld [vmem:[%s875_s4 + $0x58] sm:$0x1]  ;;  %v225_v33 = vld [vmem:[%s875_s4 + $0x60] sm:$0xff] }
  0x16   : > { %738 = vmatmul.mubr.msk.f32.vlgmr.msra.gmra.mrb[0].mxu0 %vm277_vm0, %v251_v27  ;;  %v254_v31 = vsel %vm245_vm1, %v252_v17, %v253_v23  ;;  %v259_v32 = vrot.slane %v222_v29, 1  ;;  %v226_v34 = vld [vmem:[%s875_s4 + $0x68] sm:$0x1]  ;;  %v261_v36 = vrot.slane %v223_v26, 1  ;;  %v262_v37 = vrot.slane %v224_v30, 1  ;;  %v227_v40 = vld [vmem:[%s875_s4 + $0x70] sm:$0xff] }
  0x17   : > { %740 = vmatprep.mubr.msk.f32.mxu0 %vm277_vm0, %v254_v31  ;;  %v257_v35 = vsel %vm245_vm1, %v255_v22, %v256_v28  ;;  %723 = vmatmul.mubr.msk.f32.gmra.mrb[2].mxu1 %vm277_vm0, %v219_v18  ;;  %v264_v39 = vrot.slane %v225_v33, 1  ;;  %v265_v41 = vrot.slane %v226_v34, 1  ;;  %v228_v42 = vld [vmem:[%s875_s4 + $0x78] sm:$0x1]  ;;  %v267_v44 = vrot.slane %v227_v40, 1 }
  0x18   : > { %v260_v38 = vsel %vm245_vm1, %v258_v25, %v259_v32  ;;  %725 = vmatprep.mubr.msk.f32.mxu1 %vm277_vm0, %v221_v20  ;;  %v263_v43 = vsel %vm245_vm1, %v261_v36, %v262_v37  ;;  %v268_v45 = vrot.slane %v228_v42, 1 }
  0x19   : > { %v266_v46 = vsel %vm245_vm1, %v264_v39, %v265_v41 }
  0x1a   : > { %741 = vmatmul.mubr.msk.f32.gmra.mrb[2].mxu0 %vm277_vm0, %v257_v35  ;;  %v269_v47 = vsel %vm245_vm1, %v267_v44, %v268_v45 }
  0x1b   : > { %743 = vmatprep.mubr.msk.f32.mxu0 %vm277_vm0, %v260_v38  ;;  %726 = vmatmul.mubr.msk.f32.gmra.mrb[4].mxu1 %vm277_vm0, %v223_v26 }
  0x1c   : > { %728 = vmatprep.mubr.msk.f32.mxu1 %vm277_vm0, %v225_v33 }
  0x1e   : > { %744 = vmatmul.mubr.msk.f32.gmra.mrb[4].mxu0 %vm277_vm0, %v263_v43 }
  0x1f   : > { %746 = vmatprep.mubr.msk.f32.mxu0 %vm277_vm0, %v266_v46  ;;  %729 = vmatmul.mubr.msk.f32.gmra.mrb[6].mxu1 %vm277_vm0, %v227_v40 }
  0x22   : > { %747 = vmatmul.mubr.msk.f32.gmra.mrb[6].mxu0 %vm277_vm0, %v269_v47 }
  0xe6   : > { %v721_v48 = vpop.f32.mrb[0].mxu1 }
  0xe7   : > { %v360_v49 = vpop.f32.mrb[1].mxu1 }
  0xe9   : > { %v739_v50 = vpop.f32.mrb[0].mxu0 }
  0xea   : > { %v487_v52 = vadd.f32 %v739_v50, %v721_v48  ;;  %v481_v53 = vpop.f32.mrb[1].mxu0  ;;  %v724_v55 = vpop.f32.mrb[2].mxu1 }
  0xeb   : > { %v482_v54 = vadd.f32 %v481_v53, %v360_v49  ;;  %v370_v57 = vpop.f32.mrb[3].mxu1 }
  0xec   : > { %v528_v56 = vadd.f32 %v686_v51, %v487_v52 }
  0xed   : > { %v527_v58 = vadd.f32 %v686_v51, %v482_v54  ;;  %v742_v59 = vpop.f32.mrb[2].mxu0 }
  0xee   : > { %vm536_vm2 = vcmp.gt.f32.partialorder %v528_v56, 0.0  ;;  %v544_v60 = vmul.f32 0.01, %v528_v56  ;;  %v497_v61 = vadd.f32 %v742_v59, %v724_v55  ;;  %v491_v62 = vpop.f32.mrb[3].mxu0  ;;  %v727_v1 = vpop.f32.mrb[4].mxu1 }
  0xef   : > { %vm535_vm4 = vcmp.gt.f32.partialorder %v527_v58, 0.0  ;;  %v543_v63 = vmul.f32 0.01, %v527_v58  ;;  %v492_v0 = vadd.f32 %v491_v62, %v370_v57  ;;  %v380_v4 = vpop.f32.mrb[5].mxu1 }
  0xf0   : > { %v552_v2 = vsel %vm536_vm2, %v528_v56, %v544_v60  ;;  %v530_v3 = vadd.f32 %v686_v51, %v497_v61 }
  0xf1   : > { %561 = vst.msk [vmem:[%s924_s10 + $0x8] sm:$0xff] %vm559_vm3, %v552_v2  ;;  %v551_v5 = vsel %vm535_vm4, %v527_v58, %v543_v63  ;;  %v529_v6 = vadd.f32 %v686_v51, %v492_v0  ;;  %v745_v7 = vpop.f32.mrb[4].mxu0 }
  0xf2   : > { %560 = vst.msk [vmem:[%s924_s10] sm:$0xff] %vm559_vm3, %v551_v5  ;;  %vm538_vm5 = vcmp.gt.f32.partialorder %v530_v3, 0.0  ;;  %v546_v8 = vmul.f32 0.01, %v530_v3  ;;  %v507_v9 = vadd.f32 %v745_v7, %v727_v1  ;;  %v501_v10 = vpop.f32.mrb[5].mxu0  ;;  %v730_v13 = vpop.f32.mrb[6].mxu1 }
  0xf3   : > { %vm537_vm6 = vcmp.gt.f32.partialorder %v529_v6, 0.0  ;;  %v545_v11 = vmul.f32 0.01, %v529_v6  ;;  %v502_v12 = vadd.f32 %v501_v10, %v380_v4  ;;  %v390_v16 = vpop.f32.mrb[7].mxu1 }
  0xf4   : > { %v554_v14 = vsel %vm538_vm5, %v530_v3, %v546_v8  ;;  %v532_v15 = vadd.f32 %v686_v51, %v507_v9 }
  0xf5   : > { %563 = vst.msk [vmem:[%s924_s10 + $0x18] sm:$0xff] %vm559_vm3, %v554_v14  ;;  %v553_v17 = vsel %vm537_vm6, %v529_v6, %v545_v11  ;;  %v531_v18 = vadd.f32 %v686_v51, %v502_v12  ;;  %v748_v19 = vpop.f32.mrb[6].mxu0 }
  0xf6   : > { %562 = vst.msk [vmem:[%s924_s10 + $0x10] sm:$0xff] %vm559_vm3, %v553_v17  ;;  %vm540_vm7 = vcmp.gt.f32.partialorder %v532_v15, 0.0  ;;  %v548_v20 = vmul.f32 0.01, %v532_v15  ;;  %v517_v21 = vadd.f32 %v748_v19, %v730_v13  ;;  %v511_v22 = vpop.f32.mrb[7].mxu0 }
  0xf7   : > { %vm539_vm8 = vcmp.gt.f32.partialorder %v531_v18, 0.0  ;;  %v547_v23 = vmul.f32 0.01, %v531_v18  ;;  %v512_v24 = vadd.f32 %v511_v22, %v390_v16 }
  0xf8   : > { %v556_v25 = vsel %vm540_vm7, %v532_v15, %v548_v20  ;;  %v534_v26 = vadd.f32 %v686_v51, %v517_v21 }
  0xf9   : > { %565 = vst.msk [vmem:[%s924_s10 + $0x28] sm:$0xff] %vm559_vm3, %v556_v25  ;;  %v555_v27 = vsel %vm539_vm8, %v531_v18, %v547_v23  ;;  %v533_v28 = vadd.f32 %v686_v51, %v512_v24 }
  0xfa   : > { %564 = vst.msk [vmem:[%s924_s10 + $0x20] sm:$0xff] %vm559_vm3, %v555_v27  ;;  %vm542_vm9 = vcmp.gt.f32.partialorder %v534_v26, 0.0  ;;  %v550_v29 = vmul.f32 0.01, %v534_v26 }
  0xfb   : > { %vm541_vm10 = vcmp.gt.f32.partialorder %v533_v28, 0.0  ;;  %v549_v30 = vmul.f32 0.01, %v533_v28 }
  0xfc   : > { %v558_v31 = vsel %vm542_vm9, %v534_v26, %v550_v29 }
  0xfd   : > { %567 = vst.msk [vmem:[%s924_s10 + $0x38] sm:$0xff] %vm559_vm3, %v558_v31  ;;  %v557_v32 = vsel %vm541_vm10, %v533_v28, %v549_v30 }
  0xfe   : > { %566 = vst.msk [vmem:[%s924_s10 + $0x30] sm:$0xff] %vm559_vm3, %v557_v32 }
  0xff PF: > { %s13_s14 = sadd.s32 1, %s811_s14   ;;  %s955_s12 = smov %s807_s13 }
 0x100   : > { %p10_p5 = scmp.ge.s32.totalorder %s13_s14, 4   ;;  %s956_s13 = smov %s958_s15 }
 0x102   :  { %12 = sbr.rel (!%p10_p5) target bundleno = 2 (0x2), region = 63 }

</bundles_post_ra>
